<compile_context>
chip_gen: v7x
topology: tpu7x:2x2x1
jax: 0.10.0
libtpu: 0.0.40
codegen_flags: <defaults>
</compile_context>

<pallas_src>
import jax
import jax.numpy as jnp
from jax.experimental import pallas as pl
from jax.experimental.pallas import tpu as pltpu


# ----------------------------------------------------------------------------
# Fused kernel: conv-affine, linear-affine, embedding broadcast
# ----------------------------------------------------------------------------
def _fused_kernel(p_ref, conv_ref, lin_ref, conv_o_ref, lin_o_ref, emb_o_ref):
    # Scalar parameters read once each from SMEM.
    conv_w = p_ref[0]
    conv_b = p_ref[1]
    lin_w = p_ref[2]
    lin_b = p_ref[3]
    emb_w = p_ref[4]

    # Conv1d(1, 1, kernel_size=1) on (N, 1, W) == per-element affine.
    conv_o_ref[...] = conv_ref[...] * conv_w + conv_b
    # Linear(1, 1) on (..., 1) == per-element affine.
    lin_o_ref[...] = lin_ref[...] * lin_w + lin_b
    # Embedding(num_embeddings=1, dim=1): the only valid index is 0, so the
    # lookup is a pure broadcast of the single table entry (bias-only path;
    # does not depend on any padding contents).
    emb_o_ref[...] = jnp.broadcast_to(emb_w, emb_o_ref.shape).astype(
        emb_o_ref.dtype)


def _fused_call(param_vec, conv_flat, lin_flat, n_emb):
    """param_vec: f32[8] (SMEM); conv_flat: f32[1, n_conv]; lin_flat: f32[1, n_lin]."""
    n_conv = conv_flat.shape[-1]
    n_lin = lin_flat.shape[-1]
    total = n_conv + n_lin + n_emb
    cost = pl.CostEstimate(
        flops=2 * (n_conv + n_lin),
        transcendentals=0,
        bytes_accessed=2 * 4 * total,
    )
    return pl.pallas_call(
        _fused_kernel,
        out_shape=(
            jax.ShapeDtypeStruct((1, n_conv), jnp.float32),
            jax.ShapeDtypeStruct((1, n_lin), jnp.float32),
            jax.ShapeDtypeStruct((1, n_emb), jnp.float32),
        ),
        in_specs=[
            pl.BlockSpec(memory_space=pltpu.MemorySpace.SMEM),   # packed params
            pl.BlockSpec(memory_space=pltpu.MemorySpace.VMEM),   # conv payload
            pl.BlockSpec(memory_space=pltpu.MemorySpace.VMEM),   # linear payload
        ],
        out_specs=(
            pl.BlockSpec(memory_space=pltpu.MemorySpace.VMEM),
            pl.BlockSpec(memory_space=pltpu.MemorySpace.VMEM),
            pl.BlockSpec(memory_space=pltpu.MemorySpace.VMEM),
        ),
        cost_estimate=cost,
    )(param_vec, conv_flat, lin_flat)


# ----------------------------------------------------------------------------
# Parameter packing (done ONCE, outside the per-call path)
# ----------------------------------------------------------------------------
def pack_params(params):
    """Canonical packed parameter format: f32[8] SMEM word."""
    return jnp.concatenate([
        params["conv_w"].reshape(1).astype(jnp.float32),  # Conv1d weight (1,1,1)
        params["conv_b"].reshape(1).astype(jnp.float32),  # Conv1d bias   (1,)
        params["lin_w"].reshape(1).astype(jnp.float32),   # Linear weight (1,1)
        params["lin_b"].reshape(1).astype(jnp.float32),   # Linear bias   (1,)
        params["emb_w"].reshape(1).astype(jnp.float32),   # Embedding table (1,1)
        jnp.zeros((3,), jnp.float32),                     # pad to 8
    ])


# ----------------------------------------------------------------------------
# Forward wrapper (layout plumbing only: contiguous reshapes, no slicing/scatter)
# ----------------------------------------------------------------------------
def model_forward(param_vec, conv_input, linear_input, embedding_input):
    """Mirrors ModelForIONamingTest.forward.

    param_vec:       f32[8]      packed params (see pack_params)
    conv_input:      (N, 1, W)   float32  (NCL, like PyTorch)
    linear_input:    (N, S, 1)   float32
    embedding_input: (N, S)      int32    (vocab=1, only valid index is 0)
    returns [conv_out, {'linear': ..., 'embedding': ...}]
    """
    n, c, w = conv_input.shape
    nb, s, f = linear_input.shape
    ne, se = embedding_input.shape
    n_conv = n * c * w
    n_lin = nb * s * f
    n_emb = ne * se

    # Contiguous reshapes (free bitcasts) — no slab assembly.
    conv_flat = conv_input.reshape(1, n_conv)
    lin_flat = linear_input.reshape(1, n_lin)

    # TODO(synk): embedding indices are not bounds-checked in-kernel; with
    # vocab=1 any valid index maps to the single table row, but out-of-range
    # indices silently return emb_w instead of raising like torch.nn.Embedding.
    conv_o, lin_o, emb_o = _fused_call(param_vec, conv_flat, lin_flat, n_emb)

    conv_out = conv_o.reshape(n, c, w)
    lin_out = lin_o.reshape(nb, s, f)
    emb_out = emb_o.reshape(ne, se, 1)
    return [conv_out, {"linear": lin_out, "embedding": emb_out}]


# ----------------------------------------------------------------------------
# Main
# ----------------------------------------------------------------------------
if __name__ == "__main__":
    key = jax.random.PRNGKey(0)
    k_cw, k_cb, k_lw, k_lb, k_ew, k_x1, k_x2 = jax.random.split(key, 7)

    params = {
        "conv_w": jax.random.normal(k_cw, (1, 1, 1), jnp.float32),
        "conv_b": jax.random.normal(k_cb, (1,), jnp.float32),
        "lin_w": jax.random.normal(k_lw, (1, 1), jnp.float32),
        "lin_b": jax.random.normal(k_lb, (1,), jnp.float32),
        "emb_w": jax.random.normal(k_ew, (1, 1), jnp.float32),
    }
    # Pack once — this is the canonical param format fed to the forward.
    param_vec = pack_params(params)

    # Small example inputs consistent with the module.
    N, W, S = 2, 16, 8
    conv_input = jax.random.normal(k_x1, (N, 1, W), jnp.float32)
    linear_input = jax.random.normal(k_x2, (N, S, 1), jnp.float32)
    embedding_input = jnp.zeros((N, S), jnp.int32)  # only valid index is 0

    fwd = jax.jit(model_forward)
    out = fwd(param_vec, conv_input, linear_input, embedding_input)
    conv_out, d = out[0], out[1]
    jax.block_until_ready((conv_out, d["linear"], d["embedding"]))

    # Reference check in plain JAX.
    ref_conv = conv_input * params["conv_w"][0, 0, 0] + params["conv_b"][0]
    ref_lin = linear_input * params["lin_w"][0, 0] + params["lin_b"][0]
    ref_emb = params["emb_w"][embedding_input]  # (N, S, 1)

    assert conv_out.shape == (N, 1, W)
    assert d["linear"].shape == (N, S, 1)
    assert d["embedding"].shape == (N, S, 1)
    assert jnp.allclose(conv_out, ref_conv, atol=1e-6)
    assert jnp.allclose(d["linear"], ref_lin, atol=1e-6)
    assert jnp.allclose(d["embedding"], ref_emb, atol=1e-6)

    print("KERNEL_OK")
</pallas_src>

<mosaic_0001>
module attributes {stable_mosaic.version = 11 : i64} {
  func.func @_fused_kernel(%arg0: memref<8xf32, #tpu.memory_space<smem>>, %arg1: memref<1x32xf32, #tpu.memory_space<vmem>>, %arg2: memref<1x16xf32, #tpu.memory_space<vmem>>, %arg3: memref<1x32xf32, #tpu.memory_space<vmem>>, %arg4: memref<1x16xf32, #tpu.memory_space<vmem>>, %arg5: memref<1x16xf32, #tpu.memory_space<vmem>>) attributes {dimension_semantics = [], scalar_prefetch = 0 : i64, scratch_operands = 0 : i64, tpu.core_type = #tpu.core_type<tc>} {
    %c0 = arith.constant 0 : index
    %0 = memref.load %arg0[%c0] : memref<8xf32, #tpu.memory_space<smem>>
    %c1 = arith.constant 1 : index
    %1 = memref.load %arg0[%c1] : memref<8xf32, #tpu.memory_space<smem>>
    %c2 = arith.constant 2 : index
    %2 = memref.load %arg0[%c2] : memref<8xf32, #tpu.memory_space<smem>>
    %c3 = arith.constant 3 : index
    %3 = memref.load %arg0[%c3] : memref<8xf32, #tpu.memory_space<smem>>
    %c4 = arith.constant 4 : index
    %4 = memref.load %arg0[%c4] : memref<8xf32, #tpu.memory_space<smem>>
    %c0_0 = arith.constant 0 : index
    %c0_1 = arith.constant 0 : index
    %5 = vector.load %arg1[%c0_0, %c0_1] : memref<1x32xf32, #tpu.memory_space<vmem>>, vector<1x32xf32>
    %6 = vector.broadcast %0 : f32 to vector<1x32xf32>
    %7 = arith.mulf %5, %6 : vector<1x32xf32>
    %8 = vector.broadcast %1 : f32 to vector<1x32xf32>
    %9 = arith.addf %7, %8 : vector<1x32xf32>
    %c0_2 = arith.constant 0 : index
    %c0_3 = arith.constant 0 : index
    %10 = vector.load %arg3[%c0_2, %c0_3] : memref<1x32xf32, #tpu.memory_space<vmem>>, vector<1x32xf32>
    tpu.vector_store %arg3[%c0_2, %c0_3], %9 {strides = array<i32>} : memref<1x32xf32, #tpu.memory_space<vmem>>, vector<1x32xf32>,
    %c0_4 = arith.constant 0 : index
    %c0_5 = arith.constant 0 : index
    %11 = vector.load %arg2[%c0_4, %c0_5] : memref<1x16xf32, #tpu.memory_space<vmem>>, vector<1x16xf32>
    %12 = vector.broadcast %2 : f32 to vector<1x16xf32>
    %13 = arith.mulf %11, %12 : vector<1x16xf32>
    %14 = vector.broadcast %3 : f32 to vector<1x16xf32>
    %15 = arith.addf %13, %14 : vector<1x16xf32>
    %c0_6 = arith.constant 0 : index
    %c0_7 = arith.constant 0 : index
    %16 = vector.load %arg4[%c0_6, %c0_7] : memref<1x16xf32, #tpu.memory_space<vmem>>, vector<1x16xf32>
    tpu.vector_store %arg4[%c0_6, %c0_7], %15 {strides = array<i32>} : memref<1x16xf32, #tpu.memory_space<vmem>>, vector<1x16xf32>,
    %17 = vector.broadcast %4 : f32 to vector<1x16xf32>
    %c0_8 = arith.constant 0 : index
    %c0_9 = arith.constant 0 : index
    %18 = vector.load %arg5[%c0_8, %c0_9] : memref<1x16xf32, #tpu.memory_space<vmem>>, vector<1x16xf32>
    tpu.vector_store %arg5[%c0_8, %c0_9], %17 {strides = array<i32>} : memref<1x16xf32, #tpu.memory_space<vmem>>, vector<1x16xf32>,
    return
  }
}

</mosaic_0001>

<bundles_post_ra>
// kernel: model_forward.1
= control target key start
LH: loop header
LB: loop body
LE: loop exit
PB: predicated region body
PF: predicated region fallthrough
CT: control target
= control target key end

     0   :  { %11 = vsyncpa [#allocation3], 0  ;;  %s132_s0 = inlined_call_operand.vmem [shape: f32[8], index: 0, kind: input, shape index: {}]   ;;  %s133_s1 = inlined_call_operand.vmem [shape: f32[1,32], index: 1, kind: input, shape index: {}]   ;;  %s134_s2 = inlined_call_operand.vmem [shape: f32[1,16], index: 2, kind: input, shape index: {}]   ;;  %s135_s3 = inlined_call_operand.vmem [shape: f32[1,32], index: 3, kind: output, shape index: {0}]   ;;  %s136_s4 = inlined_call_operand.vmem [shape: f32[1,16], index: 4, kind: output, shape index: {1}]   ;;  %s137_s5 = inlined_call_operand.vmem [shape: f32[1,16], index: 5, kind: output, shape index: {2}]  }
   0x1   :  { %s18_s20 = sshll.u32 %s132_s0, 4  ;;  %s19_s20 = int_to_ptr.vmem [resolvable:$true] %s18_s20 }
   0x2   :  { %s69_s21 = scalar_lea.vmem %s19_s20, 16  ;;  %p74_p1 = scmp.lt.s32.totalorder %s19_s20, %s19_s20 }
   0x3   :  { %p70_p0 = scmp.ne.s32.totalorder %s19_s20, %s69_s21  ;;  %p75_p2 = scmp.lt.s32.totalorder %s69_s21, %s69_s21 }
   0x5   :  { %p76_p3 = por %p75_p2, %p74_p1 }
   0x7   :  { %p77_p4 = pnand %p76_p3, %p70_p0 }
   0x9   :  { %80 = shalt.err (!%p77_p4)
}
   0xa   :  { %s83_s22 = smov [#allocation2]  }
   0xb   :  { %21 = dma.vmem_to_smem %s19_s20, 16, %s83_s22, [#allocation3]  }
   0xc   :  { %81 = dma.done.wait [#allocation3], 16  }
   0xd   :  { %82 = vsyncadd [#allocation3], 4294967280 }
   0xe   :  { %29 = sfence }
   0xf   :  { %s30_s23 = sld [smem:[#allocation2]]  ;;  %s64_s24 = sld [smem:[#allocation2 + $0x1]]  ;;  %v35_v0 = vld [vmem:[%s133_s1] sm:$0x1]  ;;  %vm47_vm0 = vcmask 122880   ;;  %vm40_vm1 = vcmask 253952  }
  0x10   :  { %s65_s25 = sld [smem:[#allocation2 + $0x2]]  ;;  %s66_s26 = sld [smem:[#allocation2 + $0x3]]  ;;  %v42_v1 = vld [vmem:[%s134_s2] sm:$0x1] }
  0x11   :  { %s67_s27 = sld [smem:[#allocation2 + $0x4]] }
  0x15   :  { %v36_v2 = vstv %s30_s23  ;;  %v38_v3 = vstv %s64_s24 }
  0x16   :  { %v37_v4 = vmul.f32 %v36_v2, %v35_v0  ;;  %v43_v5 = vstv %s65_s25  ;;  %v45_v6 = vstv %s66_s26 }
  0x17   :  { %v44_v7 = vmul.f32 %v43_v5, %v42_v1  ;;  %v49_v8 = vstv %s67_s27 }
  0x18   :  { %v39_v9 = vadd.f32 %v38_v3, %v37_v4  ;;  %50 = vst.msk [vmem:[%s137_s5] sm:$0x1] %vm47_vm0, %v49_v8 }
  0x19   :  { %v46_v10 = vadd.f32 %v45_v6, %v44_v7 }
  0x1a   :  { %41 = vst.msk [vmem:[%s135_s3] sm:$0x1] %vm40_vm1, %v39_v9 }
  0x1b   :  { %48 = vst.msk [vmem:[%s136_s4] sm:$0x1] %vm47_vm0, %v46_v10 }
  0x1c   :  { %63 = vsyncpa [#allocation3], 1 }

</bundles_post_ra>
